<compile_context>
chip_gen: v5e
topology: v5e:2x2
jax: 0.10.0
libtpu: 0.0.40
codegen_flags: <defaults>
</compile_context>

<pallas_src>
import functools

import jax
import jax.numpy as jnp
import numpy as np
from jax import lax
from jax.experimental import pallas as pl
from jax.experimental.pallas import tpu as pltpu


def _attn_kernel(s_ref, q_ref, out_s_ref, out_w_ref, qsum_ref, qsqsum_ref, *,
                 total_Q):
    # s_ref:    (1, N, K, D)      support slab for this batch (constant across qc)
    # q_ref:    (1, q_chunk, D)   current query chunk for this batch
    # out_s_ref:(1, N, D)         weighted prototypes (written on last chunk)
    # out_w_ref:(1, N, K)         query-guided softmax weights (written on last chunk)
    # qsum_ref: (1, D) f32        running sum_q q
    # qsqsum_ref:(1, 1) f32       running sum_q ||q||^2
    qc = pl.program_id(1)
    n_qc = pl.num_programs(1)
    q_chunk = q_ref.shape[1]

    @pl.when(qc == 0)
    def _init():
        qsum_ref[...] = jnp.zeros_like(qsum_ref)
        qsqsum_ref[...] = jnp.zeros_like(qsqsum_ref)

    # Accumulate query statistics for this chunk; mask rows past total_Q so a
    # padded final chunk never pollutes the mean (explicit sum / count, not mean).
    qb = q_ref[0]                                                   # (q_chunk, D)
    row = lax.broadcasted_iota(jnp.int32, (q_chunk, 1), 0) + qc * q_chunk
    qv = jnp.where(row < total_Q, qb, 0.0)                          # (q_chunk, D)
    qsum_ref[...] += jnp.sum(qv, axis=0, keepdims=True)             # (1, D)
    qsqsum_ref[...] += jnp.sum(qv * qv, keepdims=True)              # (1, 1)

    @pl.when(qc == n_qc - 1)
    def _finish():
        inv_q = jnp.float32(1.0 / total_Q)
        qm = qsum_ref[...] * inv_q                                  # (1, D)  mean_q q
        qsq = qsqsum_ref[...] * inv_q                               # (1, 1)  mean_q ||q||^2

        S = s_ref[0]                                                # (N, K, D)
        s_sq = jnp.sum(S * S, axis=-1)                              # (N, K)
        sdq = jnp.sum(S * qm[None, :, :], axis=-1)                  # (N, K)
        # mean_q(-||q - s||^2) = 2 s.q_mean - ||s||^2 - mean_q||q||^2
        m = jnp.tanh(2.0 * sdq - s_sq - qsq)                        # (N, K)
        m = m - jnp.max(m, axis=-1, keepdims=True)
        e = jnp.exp(m)
        w = e / jnp.sum(e, axis=-1, keepdims=True)                  # (N, K)

        out_w_ref[0] = w.astype(out_w_ref.dtype)
        # VPU weighted sum over K (no degenerate 1xK MXU matmul)
        out_s_ref[0] = jnp.sum(S * w[:, :, None], axis=1).astype(out_s_ref.dtype)


def attention_module(support, query, N, K, total_Q, hidden_size, *, q_chunk=None):
    """support: (B, N, K, 2*hid) f32, query: (B, total_Q, 2*hid) f32.

    Returns (support_out (B, N, 2*hid), weights (B, N, K, 1)), matching PyTorch.
    """
    B = support.shape[0]
    D = 2 * hidden_size
    assert support.shape == (B, N, K, D)
    assert query.shape == (B, total_Q, D)

    if q_chunk is None:
        # Cap the per-buffer query footprint (~2 MiB) so double-buffering stays
        # well inside the scoped VMEM limit even on v7x; multiple of 8 sublanes.
        budget_rows = max(8, ((2 * 1024 * 1024) // (D * 4)) // 8 * 8)
        q_chunk = total_Q if total_Q <= budget_rows else budget_rows
    num_q_chunks = pl.cdiv(total_Q, q_chunk)

    kernel = functools.partial(_attn_kernel, total_Q=total_Q)

    out_s, out_w = pl.pallas_call(
        kernel,
        out_shape=(
            jax.ShapeDtypeStruct((B, N, D), support.dtype),
            jax.ShapeDtypeStruct((B, N, K), jnp.float32),
        ),
        grid_spec=pltpu.PrefetchScalarGridSpec(
            num_scalar_prefetch=0,
            grid=(B, num_q_chunks),
            in_specs=[
                # full support slab for this batch; block index constant across qc
                pl.BlockSpec((1, N, K, D), lambda b, qc: (b, 0, 0, 0)),
                # one query chunk per inner step
                pl.BlockSpec((1, q_chunk, D), lambda b, qc: (b, qc, 0)),
            ],
            out_specs=[
                pl.BlockSpec((1, N, D), lambda b, qc: (b, 0, 0)),
                pl.BlockSpec((1, N, K), lambda b, qc: (b, 0, 0)),
            ],
            scratch_shapes=[
                pltpu.VMEM((1, D), jnp.float32),   # sum_q q
                pltpu.VMEM((1, 1), jnp.float32),   # sum_q ||q||^2
            ],
        ),
        compiler_params=pltpu.CompilerParams(
            dimension_semantics=("parallel", "arbitrary")
        ),
    )(support, query)

    weights = out_w[..., None]          # (B, N, K, 1)
    return out_s, weights


def _reference(support, query, N, K, total_Q, hidden_size):
    # pure-JAX transcription of the PyTorch forward for validation
    B = support.shape[0]
    D = 2 * hidden_size
    support_ = support.reshape(B, N * K, D)
    diff = support_[:, None, :, :] - query[:, :, None, :]            # (B, Q, NK, D)
    dist_sq = -(diff ** 2).sum(-1).reshape(B, total_Q, N, K)          # (B, Q, N, K)
    w = jax.nn.softmax(jnp.tanh(dist_sq.mean(1)), axis=-1)[..., None]  # (B, N, K, 1)
    s_out = (support * w).sum(2)                                      # (B, N, D)
    return s_out, w


if __name__ == "__main__":
    B, N, K, total_Q, hid = 2, 4, 2, 8, 16
    D = 2 * hid

    key = jax.random.PRNGKey(0)
    k1, k2 = jax.random.split(key)
    # scale inputs so tanh() is not saturated and the softmax weights are non-trivial
    support = 0.1 * jax.random.normal(k1, (B, N, K, D), dtype=jnp.float32)
    query = 0.1 * jax.random.normal(k2, (B, total_Q, D), dtype=jnp.float32)

    s_out, w_out = attention_module(support, query, N, K, total_Q, hid)
    s_out = jax.block_until_ready(s_out)
    w_out = jax.block_until_ready(w_out)

    s_ref, w_ref = _reference(support, query, N, K, total_Q, hid)
    np.testing.assert_allclose(np.asarray(s_out), np.asarray(s_ref), atol=1e-4, rtol=1e-4)
    np.testing.assert_allclose(np.asarray(w_out), np.asarray(w_ref), atol=1e-5, rtol=1e-5)

    print("KERNEL_OK")
</pallas_src>

<mosaic_0001>
module attributes {stable_mosaic.version = 11 : i64} {
  func.func @_attn_kernel(%arg0: i32, %arg1: i32, %arg2: memref<1x4x2x32xf32, #tpu.memory_space<vmem>>, %arg3: memref<1x8x32xf32, #tpu.memory_space<vmem>>, %arg4: memref<1x4x32xf32, #tpu.memory_space<vmem>>, %arg5: memref<1x4x2xf32, #tpu.memory_space<vmem>>, %arg6: memref<1x32xf32, #tpu.memory_space<vmem>>, %arg7: memref<1x1xf32, #tpu.memory_space<vmem>>) attributes {dimension_semantics = [#tpu.dimension_semantics<parallel>, #tpu.dimension_semantics<arbitrary>], iteration_bounds = array<i64: 2, 1>, scalar_prefetch = 0 : i64, scratch_operands = 2 : i64, tpu.core_type = #tpu.core_type<tc>, window_params = [{transform_indices = @transform_0, window_bounds = array<i64: 1, 4, 2, 32>}, {transform_indices = @transform_1, window_bounds = array<i64: 1, 8, 32>}, {transform_indices = @transform_2, window_bounds = array<i64: 1, 4, 32>}, {transform_indices = @transform_3, window_bounds = array<i64: 1, 4, 2>}]} {
    %c0_i32 = arith.constant 0 : i32
    %0 = arith.cmpi eq, %arg1, %c0_i32 : i32
    %1 = arith.extui %0 : i1 to i32
    %c0_i32_0 = arith.constant 0 : i32
    %2 = arith.cmpi ne, %1, %c0_i32_0 : i32
    scf.if %2 {
      %cst_16 = arith.constant 0.000000e+00 : f32
      %32 = vector.broadcast %cst_16 : f32 to vector<1x32xf32>
      %c0_17 = arith.constant 0 : index
      %c0_18 = arith.constant 0 : index
      %33 = vector.load %arg6[%c0_17, %c0_18] : memref<1x32xf32, #tpu.memory_space<vmem>>, vector<1x32xf32>
      tpu.vector_store %arg6[%c0_17, %c0_18], %32 {strides = array<i32>} : memref<1x32xf32, #tpu.memory_space<vmem>>, vector<1x32xf32>,
      %cst_19 = arith.constant 0.000000e+00 : f32
      %34 = vector.broadcast %cst_19 : f32 to vector<1x1xf32>
      %c0_20 = arith.constant 0 : index
      %c0_21 = arith.constant 0 : index
      %35 = vector.load %arg7[%c0_20, %c0_21] : memref<1x1xf32, #tpu.memory_space<vmem>>, vector<1x1xf32>
      tpu.vector_store %arg7[%c0_20, %c0_21], %34 {strides = array<i32>} : memref<1x1xf32, #tpu.memory_space<vmem>>, vector<1x1xf32>,
    } else {
    }
    %c0 = arith.constant 0 : index
    %c0_1 = arith.constant 0 : index
    %c0_2 = arith.constant 0 : index
    %3 = vector.load %arg3[%c0, %c0_1, %c0_2] : memref<1x8x32xf32, #tpu.memory_space<vmem>>, vector<1x8x32xf32>
    %4 = vector.shape_cast %3 : vector<1x8x32xf32> to vector<8x32xf32>
    %5 = tpu.iota {dimensions = array<i32: 0>} : vector<8x1xi32>
    %c8_i32 = arith.constant 8 : i32
    %6 = arith.muli %arg1, %c8_i32 : i32
    %7 = vector.broadcast %6 : i32 to vector<8x1xi32>
    %8 = arith.addi %5, %7 : vector<8x1xi32>
    %c8_i32_3 = arith.constant 8 : i32
    %9 = vector.broadcast %c8_i32_3 : i32 to vector<8x1xi32>
    %10 = arith.cmpi slt, %8, %9 : vector<8x1xi32>
    %cst = arith.constant 0.000000e+00 : f32
    %11 = vector.shape_cast %10 : vector<8x1xi1> to vector<8x1xi1>
    %12 = vector.broadcast %11 : vector<8x1xi1> to vector<8x32xi1>
    %13 = vector.broadcast %cst : f32 to vector<8x32xf32>
    %14 = arith.select %12, %4, %13 : vector<8x32xi1>, vector<8x32xf32>
    %c0_4 = arith.constant 0 : index
    %c0_5 = arith.constant 0 : index
    %15 = vector.load %arg6[%c0_4, %c0_5] : memref<1x32xf32, #tpu.memory_space<vmem>>, vector<1x32xf32>
    %cst_6 = arith.constant dense<0.000000e+00> : vector<32xf32>
    %16 = vector.multi_reduction <add>, %14, %cst_6 [0] : vector<8x32xf32> to vector<32xf32>
    %17 = vector.shape_cast %16 : vector<32xf32> to vector<1x32xf32>
    %18 = arith.addf %15, %17 : vector<1x32xf32>
    %c0_7 = arith.constant 0 : index
    %c0_8 = arith.constant 0 : index
    %19 = vector.load %arg6[%c0_7, %c0_8] : memref<1x32xf32, #tpu.memory_space<vmem>>, vector<1x32xf32>
    tpu.vector_store %arg6[%c0_7, %c0_8], %18 {strides = array<i32>} : memref<1x32xf32, #tpu.memory_space<vmem>>, vector<1x32xf32>,
    %c0_9 = arith.constant 0 : index
    %c0_10 = arith.constant 0 : index
    %20 = vector.load %arg7[%c0_9, %c0_10] : memref<1x1xf32, #tpu.memory_space<vmem>>, vector<1x1xf32>
    %21 = arith.mulf %14, %14 : vector<8x32xf32>
    %22 = vector.shape_cast %21 : vector<8x32xf32> to vector<1x8x32xf32>
    %cst_11 = arith.constant dense<0.000000e+00> : vector<1xf32>
    %23 = vector.multi_reduction <add>, %22, %cst_11 [1, 2] : vector<1x8x32xf32> to vector<1xf32>
    %24 = vector.shape_cast %23 : vector<1xf32> to vector<1x1x1xf32>
    %25 = vector.extract %24[0, 0, 0] : f32 from vector<1x1x1xf32>
    %26 = vector.broadcast %25 : f32 to vector<1x1xf32>
    %27 = arith.addf %20, %26 : vector<1x1xf32>
    %c0_12 = arith.constant 0 : index
    %c0_13 = arith.constant 0 : index
    %28 = vector.load %arg7[%c0_12, %c0_13] : memref<1x1xf32, #tpu.memory_space<vmem>>, vector<1x1xf32>
    tpu.vector_store %arg7[%c0_12, %c0_13], %27 {strides = array<i32>} : memref<1x1xf32, #tpu.memory_space<vmem>>, vector<1x1xf32>,
    %c0_i32_14 = arith.constant 0 : i32
    %29 = arith.cmpi eq, %arg1, %c0_i32_14 : i32
    %30 = arith.extui %29 : i1 to i32
    %c0_i32_15 = arith.constant 0 : i32
    %31 = arith.cmpi ne, %30, %c0_i32_15 : i32
    scf.if %31 {
      %c0_16 = arith.constant 0 : index
      %c0_17 = arith.constant 0 : index
      %32 = vector.load %arg6[%c0_16, %c0_17] : memref<1x32xf32, #tpu.memory_space<vmem>>, vector<1x32xf32>
      %cst_18 = arith.constant 1.250000e-01 : f32
      %33 = vector.broadcast %cst_18 : f32 to vector<1x32xf32>
      %34 = arith.mulf %32, %33 : vector<1x32xf32>
      %c0_19 = arith.constant 0 : index
      %c0_20 = arith.constant 0 : index
      %35 = vector.load %arg7[%c0_19, %c0_20] : memref<1x1xf32, #tpu.memory_space<vmem>>, vector<1x1xf32>
      %cst_21 = arith.constant 1.250000e-01 : f32
      %36 = vector.broadcast %cst_21 : f32 to vector<1x1xf32>
      %37 = arith.mulf %35, %36 : vector<1x1xf32>
      %c0_22 = arith.constant 0 : index
      %c0_23 = arith.constant 0 : index
      %c0_24 = arith.constant 0 : index
      %c0_25 = arith.constant 0 : index
      %38 = vector.load %arg2[%c0_22, %c0_23, %c0_24, %c0_25] : memref<1x4x2x32xf32, #tpu.memory_space<vmem>>, vector<1x4x2x32xf32>
      %39 = vector.shape_cast %38 : vector<1x4x2x32xf32> to vector<4x2x32xf32>
      %40 = arith.mulf %39, %39 : vector<4x2x32xf32>
      %cst_26 = arith.constant dense<0.000000e+00> : vector<4x2xf32>
      %41 = vector.multi_reduction <add>, %40, %cst_26 [2] : vector<4x2x32xf32> to vector<4x2xf32>
      %42 = vector.shape_cast %34 : vector<1x32xf32> to vector<1x1x32xf32>
      %43 = vector.broadcast %42 : vector<1x1x32xf32> to vector<4x2x32xf32>
      %44 = arith.mulf %39, %43 : vector<4x2x32xf32>
      %cst_27 = arith.constant dense<0.000000e+00> : vector<4x2xf32>
      %45 = vector.multi_reduction <add>, %44, %cst_27 [2] : vector<4x2x32xf32> to vector<4x2xf32>
      %cst_28 = arith.constant 2.000000e+00 : f32
      %46 = vector.broadcast %cst_28 : f32 to vector<4x2xf32>
      %47 = arith.mulf %46, %45 : vector<4x2xf32>
      %48 = arith.subf %47, %41 : vector<4x2xf32>
      %49 = vector.broadcast %37 : vector<1x1xf32> to vector<4x2xf32>
      %50 = arith.subf %48, %49 : vector<4x2xf32>
      %51 = math.tanh %50 : vector<4x2xf32>
      %cst_29 = arith.constant dense<0xFF800000> : vector<4xf32>
      %52 = vector.multi_reduction <maximumf>, %51, %cst_29 [1] : vector<4x2xf32> to vector<4xf32>
      %53 = vector.shape_cast %52 : vector<4xf32> to vector<4x1xf32>
      %54 = vector.broadcast %53 : vector<4x1xf32> to vector<4x2xf32>
      %55 = arith.subf %51, %54 : vector<4x2xf32>
      %56 = math.exp %55 : vector<4x2xf32>
      %cst_30 = arith.constant dense<0.000000e+00> : vector<4xf32>
      %57 = vector.multi_reduction <add>, %56, %cst_30 [1] : vector<4x2xf32> to vector<4xf32>
      %58 = vector.shape_cast %57 : vector<4xf32> to vector<4x1xf32>
      %59 = vector.broadcast %58 : vector<4x1xf32> to vector<4x2xf32>
      %60 = arith.divf %56, %59 : vector<4x2xf32>
      %c0_31 = arith.constant 0 : index
      %c0_32 = arith.constant 0 : index
      %c0_33 = arith.constant 0 : index
      %61 = vector.load %arg5[%c0_31, %c0_32, %c0_33] : memref<1x4x2xf32, #tpu.memory_space<vmem>>, vector<1x4x2xf32>
      %62 = vector.shape_cast %61 : vector<1x4x2xf32> to vector<4x2xf32>
      %63 = vector.shape_cast %60 : vector<4x2xf32> to vector<1x4x2xf32>
      tpu.vector_store %arg5[%c0_31, %c0_32, %c0_33], %63 {strides = array<i32>} : memref<1x4x2xf32, #tpu.memory_space<vmem>>, vector<1x4x2xf32>,
      %64 = vector.shape_cast %60 : vector<4x2xf32> to vector<4x2x1xf32>
      %65 = vector.broadcast %64 : vector<4x2x1xf32> to vector<4x2x32xf32>
      %66 = arith.mulf %39, %65 : vector<4x2x32xf32>
      %cst_34 = arith.constant dense<0.000000e+00> : vector<4x32xf32>
      %67 = vector.multi_reduction <add>, %66, %cst_34 [1] : vector<4x2x32xf32> to vector<4x32xf32>
      %c0_35 = arith.constant 0 : index
      %c0_36 = arith.constant 0 : index
      %c0_37 = arith.constant 0 : index
      %68 = vector.load %arg4[%c0_35, %c0_36, %c0_37] : memref<1x4x32xf32, #tpu.memory_space<vmem>>, vector<1x4x32xf32>
      %69 = vector.shape_cast %68 : vector<1x4x32xf32> to vector<4x32xf32>
      %70 = vector.shape_cast %67 : vector<4x32xf32> to vector<1x4x32xf32>
      tpu.vector_store %arg4[%c0_35, %c0_36, %c0_37], %70 {strides = array<i32>} : memref<1x4x32xf32, #tpu.memory_space<vmem>>, vector<1x4x32xf32>,
    } else {
    }
    return
  }
  func.func @transform_0(%arg0: i32, %arg1: i32) -> (i32, i32, i32, i32) {
    %c0_i32 = arith.constant 0 : i32
    %c0_i32_0 = arith.constant 0 : i32
    %c0_i32_1 = arith.constant 0 : i32
    %c0_i32_2 = arith.constant 0 : i32
    return %arg0, %c0_i32, %c0_i32_0, %c0_i32_1 : i32, i32, i32, i32
  }
  func.func @transform_1(%arg0: i32, %arg1: i32) -> (i32, i32, i32) {
    %c0_i32 = arith.constant 0 : i32
    %c0_i32_0 = arith.constant 0 : i32
    return %arg0, %arg1, %c0_i32 : i32, i32, i32
  }
  func.func @transform_2(%arg0: i32, %arg1: i32) -> (i32, i32, i32) {
    %c0_i32 = arith.constant 0 : i32
    %c0_i32_0 = arith.constant 0 : i32
    %c0_i32_1 = arith.constant 0 : i32
    return %arg0, %c0_i32, %c0_i32_0 : i32, i32, i32
  }
  func.func @transform_3(%arg0: i32, %arg1: i32) -> (i32, i32, i32) {
    %c0_i32 = arith.constant 0 : i32
    %c0_i32_0 = arith.constant 0 : i32
    %c0_i32_1 = arith.constant 0 : i32
    return %arg0, %c0_i32, %c0_i32_0 : i32, i32, i32
  }
}

</mosaic_0001>

<bundles_post_ra>
// kernel: tpu_custom_call.1
= control target key start
LH: loop header
LB: loop body
LE: loop exit
PB: predicated region body
PF: predicated region fallthrough
CT: control target
= control target key end

     0   :  { %s1260_s0 = inlined_call_operand.hbm [shape: f32[2,4,2,32], index: 0, kind: input, shape index: {}]   ;;  %s1261_s1 = inlined_call_operand.hbm [shape: f32[2,8,32], index: 1, kind: input, shape index: {}]   ;;  %s1262_s2 = inlined_call_operand.hbm [shape: f32[2,4,32], index: 2, kind: output, shape index: {0}]   ;;  %s1263_s3 = inlined_call_operand.vmem [shape: f32[2,4,2], index: 3, kind: output, shape index: {1}]  }
   0x1   :  { %1264 = sst [smem:[#allocation13_spill]] %s1260_s0 }
   0x2   :  { %9 = vsyncpa [#allocation5], 0 }
   0x3   :  { %11 = vsyncpa [#allocation5 + $0x1], 0 }
   0x4   :  { %12 = vsyncpa [#allocation8], 0 }
   0x5   :  { %14 = vsyncpa [#allocation8 + $0x1], 0 }
   0x6   :  { %15 = vsyncpa [#allocation6], 0 }
   0x7   :  { %17 = vsyncpa [#allocation6 + $0x1], 0  ;;  %s1020_s12 = smov 0   ;;  %s1022_s13 = smov 0  }
   0x8   :  { %s1024_s14 = smov 0   ;;  %s1026_s15 = smov 0  }
   0x9   :  { %s1028_s16 = smov 0   ;;  %s1030_s17 = smov 0  }
   0xa LB: > { %s729_s18 = sadd.s32 4294967295, %s994_s17   ;;  %s730_s19 = sadd.s32 4294967294, %s994_s17   ;;  %s994_s17 = sphi %s1030_s17, %s23_s17   ;;  %s990_s16 = sphi %s1028_s16, %s1277_s16   ;;  %s986_s15 = sphi %s1026_s15, %s1276_s15   ;;  %s982_s14 = sphi %s1024_s14, %s1275_s14   ;;  %s978_s13 = sphi %s1022_s13, %s1274_s13   ;;  %s974_s12 = sphi %s1020_s12, %s1273_s12  }
   0xb   : > { %s35_s20 = sadd.s32 1, %s990_s16  ;;  %s42_s21 = sadd.s32 1, %s982_s14 }
   0xc   : > { %p37_p0 = scmp.ge.s32.totalorder %s35_s20, 2  ;;  %p49_p1 = scmp.ne.s32.totalorder %s982_s14, %s978_s13 }
   0xd   : > { %p50_p2 = scmp.eq.s32.totalorder %s994_s17, 0  ;;  %p55_p3 = scmp.ne.s32.totalorder %s978_s13, %s974_s12 }
   0xe   : > { %s1279_s20 = smov (%p37_p0, %s35_s20), 0  ;;  %p56_p5 = scmp.eq.s32.totalorder %s729_s18, 0 }
   0xf   : > { %p1061_p4 = por %p50_p2, %p49_p1  ;;  %s39_s23 = ssub.s32 %s990_s16, %s1279_s20 }
  0x10   : > { %p107_p6 = scmp.eq.s32.totalorder %s729_s18, 1  ;;  %p40_p7 = scmp.eq.s32.totalorder %s39_s23, 0 }
  0x11   : > { %p1067_p8 = por %p56_p5, %p55_p3  ;;  %p113_p10 = scmp.eq.s32.totalorder %s730_s19, 1 }
  0x12   : > { %p1071_p9 = por %p107_p6, %p49_p1  ;;  %p732_p12 = scmp.ge.s32.totalorder %s994_s17, 2 }
  0x13   : > { %s1076_s26 = scalar_select %p40_p7, %s982_s14, %s42_s21  }
  0x14   : > { %p1078_p11 = por %p113_p10, %p55_p3  ;;  %p767_p13 = scmp.lt.s32.totalorder %s994_s17, 2 }
  0x15   : > { %s159_s28 = sand.u32 1, %s982_s14   ;;  %s747_s30 = sshll.u32 %s990_s16, 3 }
  0x16   : > { %s733_s29 = sshll.u32 %s159_s28, 3  ;;  %s1269_s0 = sld [smem:[#allocation13_spill]] }
  0x17   : > { %s163_s7 = scalar_lea.vmem [#allocation4], %s733_s29  ;;  %p1091_p0 = pnand %p767_p13, %p1061_p4 }
  0x18   : > { %s171_s8 = sshll.u32 %s163_s7, 4  ;;  %p738_p1 = scmp.ge.s32.totalorder %s994_s17, 1  ;;  %s172_s8 = int_to_ptr.vmem [resolvable:$true] %s171_s8 }
  0x19   : > { %s160_s11 = scalar_lea.sflag [#allocation5], %s159_s28  ;;  %s996_s18 = smov 32  }
  0x1a   : > { %s997_s19 = smov 2   ;;  %p199_p2 = scmp.lt.s32.totalorder %s994_s17, 3 }
  0x1b   : > { %s190_s4 = scalar_lea.hbm %s1261_s1, %s747_s30  ;;  %s185_s22 = scalar_lea.vmem [#allocation7], %s733_s29 }
  0x1c   : > { %s168_s6 = scalar_lea.hbm %s1269_s0, %s747_s30  ;;  %p200_p3 = pnand %p738_p1, %p199_p2 }
  0x1d   : > { %s169_s9 = sshll.u32 %s168_s6, 4  ;;  %s192_s5 = sshll.u32 %s190_s4, 4  ;;  %s170_s9 = int_to_ptr.hbm [resolvable:$true] %s169_s9  ;;  %s193_s5 = int_to_ptr.hbm [resolvable:$true] %s192_s5 }
  0x1e   : > { %759 = dma.hbm_to_vmem [thread:$0]  (!%p1091_p0), %s170_s9, 128, %s172_s8, %s160_s11, %s996_s18, %s996_s18, %s997_s19  }
  0x1f   : > { %s194_s6 = sshll.u32 %s185_s22, 4  ;;  %s182_s7 = scalar_lea.sflag [#allocation8], %s159_s28  ;;  %s195_s6 = int_to_ptr.vmem [resolvable:$true] %s194_s6 }
  0x20   : > { %762 = dma.hbm_to_vmem [thread:$0]  (!%p1091_p0), %s193_s5, 128, %s195_s6, %s182_s7  }
  0x21   : > { %203 = sbr.rel (%p200_p3) target bundleno = 900 (0x384), region = 28  ;;  %s1105_s0 = sand.u32 (!%p200_p3), 1, %s978_s13  }
  0x22   : > { %s739_s8 = sshll.u32 (!%p200_p3), %s1105_s0, 3  ;;  %s206_s9 = scalar_lea.sflag (!%p200_p3), [#allocation5], %s1105_s0 }
  0x23   : > { %s1109_s11 = scalar_lea.vmem (!%p200_p3), [#allocation4], %s739_s8 }
  0x26   : > { %961 = dma.done.wait (%p1067_p8), %s206_s9, 128  }
  0x27   : > { %963 = vsyncadd (%p1067_p8), %s206_s9, 4294967168  ;;  %s216_s28 = scalar_lea.sflag [#allocation8], %s1105_s0  ;;  %s219_s29 = scalar_lea.vmem [#allocation7], %s739_s8 }
  0x28   : > { %965 = dma.done.wait (%p1067_p8), %s216_s28, 128  }
  0x29   : > { %967 = vsyncadd (%p1067_p8), %s216_s28, 4294967168  ;;  %vm260_vm0 = vcmask 253952   ;;  %v998_v0 = vmov 0.0   ;;  %v264_v1 = vld [vmem:[%s219_s29] sm:$0xff]  ;;  %vm275_vm1 = vcmask 261120   ;;  %vm317_vm2 = vcmask 254976  }
  0x2a   : > { %261 = vst.msk [vmem:[#allocation2] sm:$0x1] %vm260_vm0, %v998_v0  ;;  %v287_v2 = vmul.f32 %v264_v1, %v264_v1  ;;  %v276_v3 = vsel %vm275_vm1, %v264_v1, 0.0  ;;  %v1123_v13 = vld [vmem:[%s1109_s11] sm:$0x3]  ;;  %vm262_vm3 = vcmask 0  }
  0x2b   : > { %v277_v4 = vrot.slane %v276_v3, 4  ;;  %v313_v15 = vmul.f32 %v1123_v13, %v1123_v13  ;;  %v1128_v17 = vld [vmem:[%s1109_s11 + $0x2] sm:$0x3]  ;;  %263 = vst.msk [vmem:[#allocation3] sm:$0x1] %vm262_vm3, %v998_v0  ;;  %v999_v42 = vmov 0  }
  0x2c   : > { %v288_v5 = vsel %vm275_vm1, %v287_v2, 0.0  ;;  %v314_v21 = vmul.f32 %v1128_v17, %v1128_v17  ;;  %v1137_v23 = vld [vmem:[%s1109_s11 + $0x6] sm:$0x3]  ;;  %v1148_v38 = vld [vmem:[%s1109_s11 + $0x4] sm:$0x3]  ;;  %821 = vset.pattern.permute.xlu0 %v999_v42  ;;  %823 = vset.pattern.permute.xlu1 %v999_v42  ;;  %vm381_vm4 = vcmask 1041409  }
  0x2d   : > { %289 = vadd.xlane.f32.xlu0 %v288_v5  ;;  %v278_v6 = vadd.f32 %v277_v4, %v276_v3  ;;  %v318_v18 = vsel %vm317_vm2, %v313_v15, 0.0  ;;  %v316_v29 = vmul.f32 %v1137_v23, %v1137_v23  ;;  %v315_v41 = vmul.f32 %v1148_v38, %v1148_v38  ;;  %822 = vset.pattern.permute.xlu2 %v999_v42  ;;  %p252_p4 = scmp.lt.s32.totalorder %s986_s15, 1  ;;  %s741_s23 = sshll.u32 %s1105_s0, 2 }
  0x2e   : > { %319 = vadd.xlane.f32.xlu2 %v318_v18  ;;  %v321_v26 = vsel %vm317_vm2, %v314_v21, 0.0  ;;  %vm383_vm5 = vcmask 1042434   ;;  %vm385_vm6 = vcmask 1043459   ;;  %vm388_vm7 = vcmask 11264   ;;  %s744_s4 = sshll.u32 %s986_s15, 2  ;;  %s245_s7 = scalar_lea.vmem [#allocation9], %s741_s23 }
  0x2f   : > { %v279_v7 = vrot.slane %v278_v6, 2  ;;  %v327_v30 = vsel %vm317_vm2, %v316_v29, 0.0  ;;  %v324_v43 = vsel %vm317_vm2, %v315_v41, 0.0  ;;  %s253_s30 = scalar_select %p252_p4, %s986_s15, 1 }
  0x30   : > { %s595_s6 = scalar_lea.hbm %s1262_s2, %s744_s4  ;;  %s597_s8 = sshll.u32 %s245_s7, 4  ;;  %s598_s8 = int_to_ptr.vmem [resolvable:$true] %s597_s8 }
  0x31   : > { %v280_v8 = vadd.f32 %v279_v7, %v278_v6  ;;  %v274_v10 = vld [vmem:[#allocation2] sm:$0x1]  ;;  %v375_v7 = vlaneseq  ;;  %s742_s10 = sshll.u32 %s253_s30, 2  ;;  %s599_s9 = sshll.u32 %s595_s6, 4  ;;  %s600_s9 = int_to_ptr.hbm [resolvable:$true] %s599_s9 }
  0x32   : > { %v286_v44 = vld [vmem:[#allocation3] sm:$0x1]  ;;  %s255_s21 = scalar_lea.vmem %s1263_s3, %s742_s10  ;;  %s581_s15 = scalar_lea.sflag [#allocation6], %s1105_s0 }
  0x33   : > { %v281_v9 = vrot.slane %v280_v8, 1  ;;  %s922_s11 = sshra.s32 %s600_s9, 4  ;;  %s928_s30 = scalar_lea.hbm %s1262_s2, 8  ;;  %s923_s11 = int_to_ptr.hbm [resolvable:$true] %s922_s11 }
  0x34   : > { %s924_s28 = scalar_lea.hbm %s923_s11, 4  ;;  %p929_p8 = scmp.lt.s32.totalorder %s923_s11, %s1262_s2 }
  0x35   : > { %v282_v11 = vadd.f32 %v281_v9, %v280_v8  ;;  %v1156_v8 = vand.u32 127, %v375_v7  ;;  %p925_p5 = scmp.ne.s32.totalorder %s923_s11, %s924_s28  ;;  %p930_p10 = scmp.lt.s32.totalorder %s928_s30, %s924_s28 }
  0x36   : > { %322 = vadd.xlane.f32.xlu2 %v321_v26 }
  0x37   : > { %v283_v12 = vadd.f32 %v282_v11, %v274_v10  ;;  %p926_p6 = pnand %p925_p5, %p1071_p9  ;;  %p931_p13 = por %p930_p10, %p929_p8 }
  0x39   : > { %285 = vst.msk [vmem:[#allocation2] sm:$0x1] %vm260_vm0, %v283_v12  ;;  %p927_p7 = pneg %p926_p6 }
  0x3b   : > { %p932_p0 = pnand %p931_p13, %p927_p7 }
  0x3e   : > { %328 = vadd.xlane.f32.xlu2 %v327_v30 }
  0x40   : > { %v305_v14 = vld [vmem:[#allocation2] sm:$0x1] }
  0x41   : > { %v306_v16 = vmul.f32 0.125, %v305_v14 }
  0x43   : > { %v331_v19 = vperm.slane %v306_v16, 0 }
  0x45   : > { %v333_v20 = vmul.f32 %v331_v19, %v1123_v13  ;;  %v334_v22 = vmul.f32 %v331_v19, %v1128_v17  ;;  %v336_v27 = vmul.f32 %v331_v19, %v1137_v23  ;;  %v335_v39 = vmul.f32 %v331_v19, %v1148_v38 }
  0x47   : > { %v337_v24 = vsel %vm317_vm2, %v333_v20, 0.0  ;;  %v340_v25 = vsel %vm317_vm2, %v334_v22, 0.0  ;;  %v346_v28 = vsel %vm317_vm2, %v336_v27, 0.0  ;;  %v343_v40 = vsel %vm317_vm2, %v335_v39, 0.0 }
  0x48   : > { %338 = vadd.xlane.f32.xlu0 %v337_v24  ;;  %341 = vadd.xlane.f32.xlu1 %v340_v25 }
  0x50   : > { %347 = vadd.xlane.f32.xlu0 %v346_v28  ;;  %344 = vadd.xlane.f32.xlu1 %v343_v40 }
  0x58   : > { %325 = vadd.xlane.f32.xlu1 %v324_v43 }
  0xa0   : > { %v290_v31 = vpop.xlane.xlu0 %289 }
  0xa1   : > { %v291_v32 = vrot.slane %v290_v31, 4  ;;  %v320_v51 = vpop.xlane.xlu2 %319 }
  0xa3   : > { %v292_v33 = vadd.f32 %v291_v32, %v290_v31 }
  0xa5   : > { %v293_v34 = vrot.slane %v292_v33, 2 }
  0xa7   : > { %v294_v35 = vadd.f32 %v293_v34, %v292_v33 }
  0xa9   : > { %v295_v36 = vrot.slane %v294_v35, 1  ;;  %v323_v54 = vpop.xlane.xlu2 %322 }
  0xab   : > { %v296_v37 = vadd.f32 %v295_v36, %v294_v35 }
  0xad   : > { %748 = vpush %v296_v37 }
  0xb1   : > { %v329_v61 = vpop.xlane.xlu2 %328 }
  0xbb   : > { %v342_v50 = vpop.xlane.xlu1 %341  ;;  %v339_v52 = vpop.xlane.xlu0 %338 }
  0xbc   : > { %v349_v56 = vmul.f32 2.0, %v339_v52  ;;  %v350_v57 = vmul.f32 2.0, %v342_v50 }
  0xbe   : > { %v353_v62 = vsub.f32 %v349_v56, %v320_v51  ;;  %v354_v63 = vsub.f32 %v350_v57, %v323_v54 }
  0xc3   : > { %v345_v53 = vpop.xlane.xlu1 %344  ;;  %v348_v55 = vpop.xlane.xlu0 %347 }
  0xc4   : > { %v351_v58 = vmul.f32 2.0, %v345_v53  ;;  %v352_v59 = vmul.f32 2.0, %v348_v55 }
  0xc6   : > { %v356_v1 = vsub.f32 %v352_v59, %v329_v61 }
  0xcb   : > { %v326_v60 = vpop.xlane.xlu1 %325 }
  0xcc   : > { %v355_v0 = vsub.f32 %v351_v58, %v326_v60 }
  0xde   : > { %s749_s24 = spop %748 }
  0xdf   : > { %v298_v45 = vstv %s749_s24 }
  0xe0   : > { %v299_v46 = vadd.f32 %v298_v45, %v286_v44 }
  0xe2   : > { %301 = vst.msk [vmem:[#allocation3] sm:$0x1] %vm262_vm3, %v299_v46 }
  0xe9   : > { %v307_v47 = vld [vmem:[#allocation3] sm:$0x1] }
  0xea   : > { %v308_v48 = vmul.f32 0.125, %v307_v47 }
  0xec   : > { %v358_v49 = vperm.slane %v308_v48, 0 }
  0xee   : > { %360 = vperm.xlu0 %821, %v358_v49  }
 0x160   : > { %v361_v2 = vpop.permute.xlu0 %360 }
 0x161   : > { %v363_v3 = vsub.f32 %v353_v62, %v361_v2  ;;  %v364_v4 = vsub.f32 %v354_v63, %v361_v2  ;;  %v365_v5 = vsub.f32 %v355_v0, %v361_v2  ;;  %v366_v6 = vsub.f32 %v356_v1, %v361_v2 }
 0x163   : > { %824 = vtanh.f32 %v363_v3 }
 0x164   : > { %826 = vtanh.f32 %v364_v4 }
 0x165   : > { %828 = vtanh.f32 %v365_v5 }
 0x166   : > { %830 = vtanh.f32 %v366_v6 }
 0x169   : > { %v825_v9 = vpop.eup %824 }
 0x16a   : > { %v827_v10 = vpop.eup %826  ;;  %v377_v11 = vperm.slane %v825_v9, %v1156_v8 }
 0x16b   : > { %v829_v12 = vpop.eup %828  ;;  %v378_v14 = vperm.slane %v827_v10, %v1156_v8 }
 0x16c   : > { %v831_v15 = vpop.eup %830  ;;  %v379_v16 = vperm.slane %v829_v12, %v1156_v8 }
 0x16d   : > { %v380_v18 = vperm.slane %v831_v15, %v1156_v8  ;;  %v382_v19 = vsel %vm381_vm4, %v378_v14, %v377_v11 }
 0x16e   : > { %v384_v20 = vsel %vm383_vm5, %v379_v16, %v382_v19 }
 0x16f   : > { %v386_v21 = vsel %vm385_vm6, %v380_v18, %v384_v20 }
 0x170   : > { %v389_v22 = vsel %vm388_vm7, %v386_v21, -inf }
 0x171   : > { %390 = vmax.xlane.f32.xlu1 %v389_v22 }
 0x1e4   : > { %v391_v24 = vpop.xlane.xlu1 %390 }
 0x1e5   : > { %v393_v25 = vperm.slane %v391_v24, 0  ;;  %v394_v26 = vperm.slane %v391_v24, 1  ;;  %v395_v27 = vperm.slane %v391_v24, 2  ;;  %v396_v33 = vperm.slane %v391_v24, 3 }
 0x1e7   : > { %v401_v28 = vsub.f32 %v825_v9, %v393_v25  ;;  %v402_v29 = vsub.f32 %v827_v10, %v394_v26  ;;  %v403_v32 = vsub.f32 %v829_v12, %v395_v27  ;;  %v404_v37 = vsub.f32 %v831_v15, %v396_v33 }
 0x1e9   : > { %v405_v30 = vmul.f32 1.442695, %v401_v28  ;;  %v407_v31 = vmul.f32 1.442695, %v402_v29  ;;  %v409_v34 = vmul.f32 1.442695, %v403_v32 }
 0x1ea   : > { %v411_v39 = vmul.f32 1.442695, %v404_v37 }
 0x1eb   : > { %832 = vpow2.f32 %v405_v30 }
 0x1ec   : > { %834 = vpow2.f32 %v407_v31 }
 0x1ed   : > { %836 = vpow2.f32 %v409_v34 }
 0x1ee   : > { %838 = vpow2.f32 %v411_v39 }
 0x1f1   : > { %v1166_v35 = vpop.eup %832 }
 0x1f2   : > { %v1168_v36 = vpop.eup %834  ;;  %418 = vperm.xlu2 %822, %v1166_v35  }
 0x1f3   : > { %421 = vperm.xlu1 %823, %v1168_v36   ;;  %v1172_v40 = vpop.eup %836 }
 0x1f4   : > { %v1175_v41 = vpop.eup %838 }
 0x1fa   : > { %424 = vperm.xlu2 %822, %v1172_v40  }
 0x202   : > { %427 = vperm.xlu2 %822, %v1175_v41  }
 0x24c   : > { %v419_v42 = vpop.permute.xlu2 %418 }
 0x24d   : > { %v429_v46 = vperm.slane %v419_v42, %v1156_v8 }
 0x254   : > { %v425_v43 = vpop.permute.xlu2 %424 }
 0x255   : > { %v431_v48 = vperm.slane %v425_v43, %v1156_v8 }
 0x25c   : > { %v428_v44 = vpop.permute.xlu2 %427 }
 0x25d   : > { %v432_v49 = vperm.slane %v428_v44, %v1156_v8 }
 0x265   : > { %v422_v45 = vpop.permute.xlu1 %421 }
 0x266   : > { %v430_v47 = vperm.slane %v422_v45, %v1156_v8 }
 0x268   : > { %v433_v50 = vsel %vm381_vm4, %v430_v47, %v429_v46 }
 0x269   : > { %v434_v51 = vsel %vm383_vm5, %v431_v48, %v433_v50 }
 0x26a   : > { %v435_v52 = vsel %vm385_vm6, %v432_v49, %v434_v51 }
 0x26b   : > { %v437_v53 = vsel %vm388_vm7, %v435_v52, 0.0 }
 0x26c   : > { %438 = vadd.xlane.f32.xlu1 %v437_v53 }
 0x2df   : > { %v439_v54 = vpop.xlane.xlu1 %438 }
 0x2e0   : > { %v441_v55 = vperm.slane %v439_v54, 0  ;;  %v442_v56 = vperm.slane %v439_v54, 1  ;;  %v443_v57 = vperm.slane %v439_v54, 2  ;;  %v444_v58 = vperm.slane %v439_v54, 3 }
 0x2e2   : > { %840 = vrcp.f32 %v441_v55  ;;  %v473_v0 = vand.u32 2147483647, %v442_v56  ;;  %v475_v3 = vand.u32 2147483648, %v442_v56  ;;  %v458_v5 = vand.u32 2147483647, %v441_v55 }
 0x2e3   : > { %842 = vrcp.f32 %v442_v56  ;;  %vm469_vm8 = vweird.f32 %v442_v56  ;;  %v460_v9 = vand.u32 2147483648, %v441_v55  ;;  %vm454_vm9 = vweird.f32 %v441_v55 }
 0x2e4   : > { %844 = vrcp.f32 %v443_v57  ;;  %vm1186_vm12 = vcmp.eq.f32.partialorder %v473_v0, 8.507059e+37  ;;  %v476_v16 = vor.u32 1.1754944e-38, %v475_v3  ;;  %vm459_vm13 = vcmp.eq.f32.partialorder %v458_v5, 8.507059e+37 }
 0x2e5   : > { %846 = vrcp.f32 %v444_v58  ;;  %v461_v21 = vor.u32 1.1754944e-38, %v460_v9  ;;  %v505_v24 = vand.u32 2147483648, %v444_v58  ;;  %v490_v27 = vand.u32 2147483648, %v443_v57 }
 0x2e6   : > { %vm484_vm3 = vweird.f32 %v443_v57  ;;  %v488_v33 = vand.u32 2147483647, %v443_v57  ;;  %v503_v37 = vand.u32 2147483647, %v444_v58 }
 0x2e7   : > { %v491_v43 = vor.u32 1.1754944e-38, %v490_v27  ;;  %v506_v44 = vor.u32 1.1754944e-38, %v505_v24 }
 0x2e8   : > { %v841_v59 = vpop.eup %840 }
 0x2e9   : > { %v843_v60 = vpop.eup %842  ;;  %v450_v61 = vmul.f32 %v841_v59, %v441_v55  ;;  %vm455_vm10 = vweird.f32 %v841_v59 }
 0x2ea   : > { %v845_v62 = vpop.eup %844  ;;  %v465_v63 = vmul.f32 %v843_v60, %v442_v56  ;;  %vm470_vm11 = vweird.f32 %v843_v60  ;;  %vm456_vm14 = vmor %vm454_vm9, %vm455_vm10  ;;  %vm499_vm9 = vweird.f32 %v444_v58 }
 0x2eb   : > { %v847_v1 = vpop.eup %846  ;;  %v480_v2 = vmul.f32 %v845_v62, %v443_v57  ;;  %v451_v4 = vsub.f32 1.0, %v450_v61  ;;  %vm471_vm15 = vmor %vm469_vm8, %vm470_vm11  ;;  %vm485_vm0 = vweird.f32 %v845_v62  ;;  %vm489_vm11 = vcmp.eq.f32.partialorder %v488_v33, 8.507059e+37 }
 0x2ec   : > { %v495_v6 = vmul.f32 %v847_v1, %v444_v58  ;;  %v466_v7 = vsub.f32 1.0, %v465_v63  ;;  %vm500_vm1 = vweird.f32 %v847_v1  ;;  %vm486_vm8 = vmor %vm484_vm3, %vm485_vm0 }
 0x2ed   : > { %v452_v10 = vmul.f32 %v841_v59, %v451_v4  ;;  %v481_v11 = vsub.f32 1.0, %v480_v2  ;;  %vm501_vm10 = vmor %vm499_vm9, %vm500_vm1 }
 0x2ee   : > { %v467_v12 = vmul.f32 %v843_v60, %v466_v7  ;;  %v496_v15 = vsub.f32 1.0, %v495_v6 }
 0x2ef   : > { %v453_v18 = vadd.f32 %v841_v59, %v452_v10  ;;  %v482_v19 = vmul.f32 %v845_v62, %v481_v11 }
 0x2f0   : > { %v468_v20 = vadd.f32 %v843_v60, %v467_v12  ;;  %v497_v22 = vmul.f32 %v847_v1, %v496_v15 }
 0x2f1   : > { %v457_v25 = vsel %vm456_vm14, %v841_v59, %v453_v18  ;;  %v483_v26 = vadd.f32 %v845_v62, %v482_v19 }
 0x2f2   : > { %v472_v28 = vsel %vm471_vm15, %v843_v60, %v468_v20  ;;  %v462_v29 = vsel %vm459_vm13, %v461_v21, %v457_v25  ;;  %v498_v30 = vadd.f32 %v847_v1, %v497_v22  ;;  %vm504_vm13 = vcmp.eq.f32.partialorder %v503_v37, 8.507059e+37 }
 0x2f3   : > { %v477_v31 = vsel %vm1186_vm12, %v476_v16, %v472_v28  ;;  %v463_v32 = vmul.f32 %v1166_v35, %v462_v29  ;;  %v487_v39 = vsel %vm486_vm8, %v845_v62, %v483_v26 }
 0x2f4   : > { %v478_v34 = vmul.f32 %v1168_v36, %v477_v31  ;;  %v502_v42 = vsel %vm501_vm10, %v847_v1, %v498_v30  ;;  %v492_v45 = vsel %vm489_vm11, %v491_v43, %v487_v39 }
 0x2f5   : > { %514 = vperm.xlu0 %821, %v463_v32   ;;  %v507_v46 = vsel %vm504_vm13, %v506_v44, %v502_v42  ;;  %v493_v35 = vmul.f32 %v1172_v40, %v492_v45 }
 0x2f6   : > { %517 = vperm.xlu2 %822, %v478_v34   ;;  %v508_v36 = vmul.f32 %v1175_v41, %v507_v46 }
 0x2fd   : > { %520 = vperm.xlu0 %821, %v493_v35  }
 0x2fe   : > { %523 = vperm.xlu2 %822, %v508_v36  }
 0x350   : > { %v518_v47 = vpop.permute.xlu2 %517 }
 0x351   : > { %v539_v49 = vmul.f32 %v518_v47, %v1128_v17 }
 0x353   : > { %v549_v51 = vsel %vm317_vm2, %v539_v49, 0.0 }
 0x354   : > { %v550_v54 = vrot.slane %v549_v51, 4 }
 0x356   : > { %v551_v57 = vadd.f32 %v550_v54, %v549_v51 }
 0x358   : > { %v524_v48 = vpop.permute.xlu2 %523  ;;  %v552_v62 = vrot.slane %v551_v57, 2 }
 0x359   : > { %v541_v50 = vmul.f32 %v524_v48, %v1137_v23  ;;  %v526_v23 = vperm.slane %v518_v47, %v1156_v8  ;;  %v528_v0 = vperm.slane %v524_v48, %v1156_v8 }
 0x35a   : > { %v553_v9 = vadd.f32 %v552_v62, %v551_v57 }
 0x35b   : > { %v563_v52 = vsel %vm317_vm2, %v541_v50, 0.0 }
 0x35c   : > { %v564_v55 = vrot.slane %v563_v52, 4  ;;  %v554_v12 = vrot.slane %v553_v9, 1 }
 0x35e   : > { %v565_v59 = vadd.f32 %v564_v55, %v563_v52  ;;  %v555_v19 = vadd.f32 %v554_v12, %v553_v9 }
 0x360   : > { %v566_v2 = vrot.slane %v565_v59, 2 }
 0x367   : > { %v515_v53 = vpop.permute.xlu0 %514 }
 0x368   : > { %v538_v40 = vmul.f32 %v515_v53, %v1123_v13  ;;  %v525_v58 = vperm.slane %v515_v53, %v1156_v8 }
 0x36a   : > { %v542_v41 = vsel %vm317_vm2, %v538_v40, 0.0  ;;  %v529_v1 = vsel %vm381_vm4, %v526_v23, %v525_v58 }
 0x36b   : > { %v543_v56 = vrot.slane %v542_v41, 4 }
 0x36d   : > { %v544_v17 = vadd.f32 %v543_v56, %v542_v41 }
 0x36f   : > { %v545_v60 = vrot.slane %v544_v17, 2  ;;  %v521_v61 = vpop.permute.xlu0 %520 }
 0x370   : > { %v527_v63 = vperm.slane %v521_v61, %v1156_v8  ;;  %v540_v13 = vmul.f32 %v521_v61, %v1148_v38  ;;  %v567_v8 = vadd.f32 %v566_v2, %v565_v59 }
 0x371   : > { %v546_v3 = vadd.f32 %v545_v60, %v544_v17 }
 0x372   : > { %v530_v4 = vsel %vm383_vm5, %v527_v63, %v529_v1  ;;  %v556_v5 = vsel %vm317_vm2, %v540_v13, 0.0  ;;  %v568_v15 = vrot.slane %v567_v8, 1  ;;  %vm578_vm2 = vcmask 257024  }
 0x373   : > { %v531_v6 = vsel %vm385_vm6, %v528_v0, %v530_v4  ;;  %v557_v7 = vrot.slane %v556_v5, 4  ;;  %v547_v10 = vrot.slane %v546_v3, 1 }
 0x374   : > { %533 = vst.msk [vmem:[%s255_s21] sm:$0xf] %vm388_vm7, %v531_v6  ;;  %v569_v21 = vadd.f32 %v568_v15, %v567_v8 }
 0x375   : > { %v558_v38 = vadd.f32 %v557_v7, %v556_v5  ;;  %v548_v16 = vadd.f32 %v547_v10, %v546_v3 }
 0x377   : > { %v559_v11 = vrot.slane %v558_v38, 2  ;;  %v574_v22 = vsel %vm381_vm4, %v555_v19, %v548_v16 }
 0x379   : > { %v560_v14 = vadd.f32 %v559_v11, %v558_v38 }
 0x37b   : > { %v561_v18 = vrot.slane %v560_v14, 1 }
 0x37d   : > { %v562_v20 = vadd.f32 %v561_v18, %v560_v14 }
 0x37f   : > { %v575_v24 = vsel %vm383_vm5, %v562_v20, %v574_v22 }
 0x380   : > { %v576_v25 = vsel %vm385_vm6, %v569_v21, %v575_v24 }
 0x381   : > { %579 = vst.msk [vmem:[%s245_s7] sm:$0xf] %vm578_vm2, %v576_v25 }
 0x382   : > { %935 = shalt.err (!%p932_p0)
}
 0x383   : > { %754 = dma.vmem_to_hbm [thread:$0]  (%p1071_p9), %s598_s8, 64, %s600_s9, %s581_s15  }
 0x384 PF: > { %s614_s0 = sand.u32 1, %s974_s12   ;;  %p764_p1 = pnand %p732_p12, %p1078_p11 }
 0x385   : > { %s615_s19 = scalar_lea.sflag [#allocation6], %s614_s0 }
 0x386   : > { %p765_p2 = pneg %p764_p1 }
 0x388   : > { %969 = dma.done.wait (%p765_p2), %s615_s19, 64  }
 0x389   : > { %971 = vsyncadd (%p765_p2), %s615_s19, 4294967232  ;;  %s23_s17 = sadd.s32 1, %s994_s17   ;;  %s1273_s12 = smov %s978_s13 }
 0x38a   : > { %p20_p3 = scmp.ge.s32.totalorder %s23_s17, 4   ;;  %s1274_s13 = smov %s982_s14 }
 0x38b   : > { %s1275_s14 = smov %s1076_s26  ;;  %s1276_s15 = smov %s990_s16 }
 0x38c   : > { %s1277_s16 = smov %s1279_s20  ;;  %22 = sbr.rel (!%p20_p3) target bundleno = 10 (0xa), region = 106 }
 0x391   :  { %628 = vsyncpa [#allocation5], 1 }
 0x392   :  { %630 = vsyncpa [#allocation5 + $0x1], 1 }
 0x393   :  { %631 = vsyncpa [#allocation8], 1 }
 0x394   :  { %633 = vsyncpa [#allocation8 + $0x1], 1 }
 0x395   :  { %634 = vsyncpa [#allocation6], 1 }
 0x396   :  { %636 = vsyncpa [#allocation6 + $0x1], 1 }

</bundles_post_ra>
